<compile_context>
chip_gen: v7x
topology: tpu7x:2x2x1
jax: 0.10.0
libtpu: 0.0.40
codegen_flags: <defaults>
</compile_context>

<pallas_src>
import math

import jax
import jax.numpy as jnp
from jax.experimental import pallas as pl
from jax.experimental.pallas import tpu as pltpu


# --------------------------------------------------------------------------- #
# Kernel: one sequence tile per grid step.
#   x_ref  : (TS, B, D)  input tile   (seq-first layout, like the torch module)
#   pe_ref : (TS, 1, D)  positional-encoding tile, broadcast over the batch dim
#   out_ref: (TS, B, D)
# --------------------------------------------------------------------------- #
def _pos_embed_kernel(x_ref, pe_ref, out_ref):
    out_ref[...] = x_ref[...] + pe_ref[...]        # (TS,1,D) broadcasts over B


# --------------------------------------------------------------------------- #
# One-time buffer construction (matches torch __init__ exactly).
# --------------------------------------------------------------------------- #
def make_positional_encoding(d_model, max_length=512, dtype=jnp.float32):
    assert d_model % 2 == 0, "d_model must be even (as in the torch module)"
    position = jnp.arange(max_length, dtype=jnp.float32)[:, None]                 # (L, 1)
    div_term = jnp.exp(jnp.arange(0, d_model, 2, dtype=jnp.float32)
                       * (-math.log(10000.0) / d_model))                          # (D/2,)
    angles = position * div_term                                                  # (L, D/2)
    # interleave: even cols = sin, odd cols = cos  (== pe[:,0::2]=sin, pe[:,1::2]=cos)
    pe = jnp.stack([jnp.sin(angles), jnp.cos(angles)], axis=-1).reshape(max_length, d_model)
    return pe.astype(dtype)[:, None, :]                                           # (L, 1, D)


def _pick_seq_tile(S, B, D, itemsize, vmem_budget_bytes=4 << 20):
    """Largest divisor of S whose double-buffered working set fits the budget."""
    bytes_per_row = (2 * B + 1) * D * itemsize          # x tile + out tile + pe tile
    max_rows = max(1, vmem_budget_bytes // (2 * bytes_per_row))   # x2: double buffering
    tile = 1
    for t in range(1, S + 1):
        if S % t == 0 and t <= max_rows:
            tile = t
    return tile


# --------------------------------------------------------------------------- #
# Wrapper: x (S, B, D) -> x + pe[:S]
# --------------------------------------------------------------------------- #
def positional_embedding(x, pe, *, seq_tile=None, interpret=False):
    S, B, D = x.shape
    L = pe.shape[0]
    assert pe.shape == (L, 1, D) and S <= L, "pe must be (max_length, 1, d_model) with S <= max_length"

    pe_s = pe[:S]                                        # == self.pe[:x.size(0), :]

    if seq_tile is None:
        seq_tile = _pick_seq_tile(S, B, D, x.dtype.itemsize)
    assert S % seq_tile == 0

    seq_blocks = S // seq_tile
    x_spec = pl.BlockSpec((seq_tile, B, D), lambda s: (s, 0, 0))
    pe_spec = pl.BlockSpec((seq_tile, 1, D), lambda s: (s, 0, 0))

    return pl.pallas_call(
        _pos_embed_kernel,
        out_shape=jax.ShapeDtypeStruct((S, B, D), x.dtype),
        grid=(seq_blocks,),
        in_specs=[x_spec, pe_spec],
        out_specs=x_spec,
        compiler_params=pltpu.CompilerParams(
            dimension_semantics=("parallel",),           # shard seq tiles across TCs
            vmem_limit_bytes=32 << 20,                   # explicit budget, safe on v5e/v6e/v7x
        ),
        interpret=interpret,
    )(x, pe_s)


# --------------------------------------------------------------------------- #
# Plain-JAX reference mirroring the PyTorch forward exactly.
# --------------------------------------------------------------------------- #
def _reference(x, pe):
    return x + pe[: x.shape[0], :]


if __name__ == "__main__":
    # Small shapes consistent with the module: seq-first layout (S, B, d_model).
    S, B, D = 16, 2, 32
    MAX_LEN = 512                                        # module default

    key = jax.random.PRNGKey(0)
    x = jax.random.normal(key, (S, B, D), dtype=jnp.float32)

    pe = make_positional_encoding(D, max_length=MAX_LEN, dtype=jnp.float32)

    # seq_tile=8 -> grid of 2 parallel, pipelined steps at this toy size.
    out = positional_embedding(x, pe, seq_tile=8)
    out = jax.block_until_ready(out)

    ref = _reference(x, pe)
    assert out.shape == (S, B, D)
    assert jnp.allclose(out, ref, atol=1e-6, rtol=1e-6), "mismatch vs reference"

    print("KERNEL_OK")
</pallas_src>

<mosaic_0001>
module attributes {stable_mosaic.version = 11 : i64} {
  func.func @_pos_embed_kernel(%arg0: i32, %arg1: memref<8x2x32xf32, #tpu.memory_space<vmem>>, %arg2: memref<8x1x32xf32, #tpu.memory_space<vmem>>, %arg3: memref<8x2x32xf32, #tpu.memory_space<vmem>>) attributes {dimension_semantics = [#tpu.dimension_semantics<parallel>], iteration_bounds = array<i64: 2>, scalar_prefetch = 0 : i64, scratch_operands = 0 : i64, tpu.core_type = #tpu.core_type<tc>, window_params = [{transform_indices = @transform_0, window_bounds = array<i64: 8, 2, 32>}, {transform_indices = @transform_1, window_bounds = array<i64: 8, 1, 32>}, {transform_indices = @transform_2, window_bounds = array<i64: 8, 2, 32>}]} {
    %c0 = arith.constant 0 : index
    %c0_0 = arith.constant 0 : index
    %c0_1 = arith.constant 0 : index
    %0 = vector.load %arg1[%c0, %c0_0, %c0_1] : memref<8x2x32xf32, #tpu.memory_space<vmem>>, vector<8x2x32xf32>
    %c0_2 = arith.constant 0 : index
    %c0_3 = arith.constant 0 : index
    %c0_4 = arith.constant 0 : index
    %1 = vector.load %arg2[%c0_2, %c0_3, %c0_4] : memref<8x1x32xf32, #tpu.memory_space<vmem>>, vector<8x1x32xf32>
    %2 = vector.broadcast %1 : vector<8x1x32xf32> to vector<8x2x32xf32>
    %3 = arith.addf %0, %2 : vector<8x2x32xf32>
    %c0_5 = arith.constant 0 : index
    %c0_6 = arith.constant 0 : index
    %c0_7 = arith.constant 0 : index
    %4 = vector.load %arg3[%c0_5, %c0_6, %c0_7] : memref<8x2x32xf32, #tpu.memory_space<vmem>>, vector<8x2x32xf32>
    tpu.vector_store %arg3[%c0_5, %c0_6, %c0_7], %3 {strides = array<i32>} : memref<8x2x32xf32, #tpu.memory_space<vmem>>, vector<8x2x32xf32>,
    return
  }
  func.func @transform_0(%arg0: i32) -> (i32, i32, i32) {
    %c0_i32 = arith.constant 0 : i32
    %c0_i32_0 = arith.constant 0 : i32
    %c0_i32_1 = arith.constant 0 : i32
    return %arg0, %c0_i32, %c0_i32_0 : i32, i32, i32
  }
  func.func @transform_1(%arg0: i32) -> (i32, i32, i32) {
    %c0_i32 = arith.constant 0 : i32
    %c0_i32_0 = arith.constant 0 : i32
    %c0_i32_1 = arith.constant 0 : i32
    return %arg0, %c0_i32, %c0_i32_0 : i32, i32, i32
  }
  func.func @transform_2(%arg0: i32) -> (i32, i32, i32) {
    %c0_i32 = arith.constant 0 : i32
    %c0_i32_0 = arith.constant 0 : i32
    %c0_i32_1 = arith.constant 0 : i32
    return %arg0, %c0_i32, %c0_i32_0 : i32, i32, i32
  }
}

</mosaic_0001>

<bundles_post_ra>
// kernel: tpu_custom_call.1
= control target key start
LH: loop header
LB: loop body
LE: loop exit
PB: predicated region body
PF: predicated region fallthrough
CT: control target
= control target key end

     0   :  { %7 = vsyncpa [#allocation3], 0  ;;  %s891_s0 = inlined_call_operand.hbm [shape: f32[16,2,32], index: 0, kind: input, shape index: {}]   ;;  %s892_s1 = inlined_call_operand.hbm [shape: f32[16,1,32], index: 1, kind: input, shape index: {}]   ;;  %s893_s2 = inlined_call_operand.hbm [shape: f32[16,2,32], index: 2, kind: output, shape index: {}]  }
   0x1   :  { %9 = vsyncpa [#allocation3 + $0x1], 0 }
   0x2   :  { %10 = vsyncpa [#allocation6], 0 }
   0x3   :  { %12 = vsyncpa [#allocation6 + $0x1], 0 }
   0x4   :  { %13 = vsyncpa [#allocation4], 0 }
   0x5   :  { %15 = vsyncpa [#allocation4 + $0x1], 0  ;;  %s638_s9 = smov 0   ;;  %s640_s10 = smov 0  }
   0x6   :  { %s642_s11 = smov 0   ;;  %s644_s12 = smov 0  }
   0x7 LB: > { %s659_s13 = sadd.s32 4294967295, %s612_s12   ;;  %s396_s14 = sadd.s32 4294967294, %s612_s12   ;;  %s612_s12 = sphi %s644_s12, %s909_s12   ;;  %s608_s11 = sphi %s642_s11, %s908_s11   ;;  %s604_s10 = sphi %s640_s10, %s907_s10   ;;  %s600_s9 = sphi %s638_s9, %s906_s9  }
   0x8   : > { %s663_s15 = sadd.s32 1, %s612_s12   ;;  %s28_s16 = sadd.s32 1, %s608_s11 }
   0x9   : > { %s25_s17 = ssub.s32 %s612_s12, %s663_s15  ;;  %p35_p0 = scmp.ne.s32.totalorder %s608_s11, %s604_s10 }
   0xa   : > { %p26_p1 = scmp.eq.s32.totalorder %s25_s17, 0  ;;  %p36_p2 = scmp.eq.s32.totalorder %s612_s12, 0 }
   0xb   : > { %p41_p3 = scmp.ne.s32.totalorder %s604_s10, %s600_s9  ;;  %p42_p4 = scmp.eq.s32.totalorder %s659_s13, 0 }
   0xc   : > { %s675_s18 = scalar_select %p26_p1, %s608_s11, %s28_s16  }
   0xd   : > { %p677_p5 = por %p36_p2, %p35_p0  ;;  %p681_p6 = por %p42_p4, %p41_p3 }
   0xe   : > { %p91_p7 = scmp.eq.s32.totalorder %s659_s13, 1  ;;  %p97_p8 = scmp.eq.s32.totalorder %s396_s14, 1 }
   0xf   : > { %s897_s20 = scalar_select %p681_p6, 1, 0 }
  0x10   : > { %p442_p10 = scmp.lt.s32.totalorder %s612_s12, 2  ;;  %p688_p11 = por %p91_p7, %p35_p0 }
  0x11   : > { %p692_p12 = por %p97_p8, %p41_p3  ;;  %s697_s23 = sand.u32 1, %s608_s11  }
  0x12   : > { %s898_s21 = scalar_select %p688_p11, 1, 0 }
  0x13   : > { %s899_s22 = scalar_select %p692_p12, 1, 0 }
  0x14   : > { %s422_s24 = sshll.u32 %s612_s12, 8  ;;  %s399_s25 = sshll.u32 %s697_s23, 4 }
  0x15   : > { %s704_s28 = scalar_lea.hbm %s891_s0, %s422_s24  ;;  %s121_s29 = scalar_lea.vmem [#allocation2], %s399_s25 }
  0x16   : > { %s128_s30 = sshll.u32 %s121_s29, 4  ;;  %p708_p13 = pnand %p442_p10, %p677_p5  ;;  %s712_s30 = int_to_ptr.vmem [resolvable:$true] %s128_s30 }
  0x17   : > { %s118_s4 = scalar_lea.sflag [#allocation3], %s697_s23  ;;  %s482_s5 = scalar_lea.hbm %s704_s28, 256 }
  0x18   : > { %p483_p0 = scmp.ne.s32.totalorder %s704_s28, %s482_s5  ;;  %p484_p1 = pneg %p708_p13 }
  0x19   : > { %s487_s8 = scalar_lea.hbm %s891_s0, 512  ;;  %p488_p4 = scmp.lt.u32.totalorder %s704_s28, %s891_s0 }
  0x1a   : > { %p485_p2 = pnand %p484_p1, %p483_p0  ;;  %p489_p5 = scmp.lt.u32.totalorder %s487_s8, %s482_s5 }
  0x1b   : > { %p491_p8 = scmp.lt.u32.totalorder %s482_s5, %s704_s28 }
  0x1c   : > { %p486_p3 = pneg %p485_p2  ;;  %p490_p7 = por %p489_p5, %p488_p4 }
  0x1e   : > { %p492_p10 = por %p491_p8, %p490_p7 }
  0x20   : > { %p493_p9 = pnand %p492_p10, %p486_p3 }
  0x22   : > { %496 = shalt.err (!%p493_p9)
}
  0x23   : > { %s497_s17 = scalar_lea.vmem %s712_s30, 256  ;;  %s614_s19 = smov [#allocation2]  }
  0x24   : > { %p498_p0 = scmp.ne.s32.totalorder %s712_s30, %s497_s17  ;;  %s502_s24 = sshll.u32 %s614_s19, 4  ;;  %s503_s24 = int_to_ptr.vmem [resolvable:$false] %s502_s24 }
  0x25   : > { %s504_s25 = scalar_lea.vmem %s503_s24, 512  ;;  %p505_p11 = scmp.lt.s32.totalorder %s712_s30, %s503_s24 }
  0x26   : > { %p500_p2 = pnand %p498_p0, %p484_p1  ;;  %p506_p4 = scmp.lt.s32.totalorder %s504_s25, %s497_s17 }
  0x28   : > { %p501_p12 = pneg %p500_p2  ;;  %p507_p5 = por %p506_p4, %p505_p11 }
  0x2a   : > { %p508_p7 = pnand %p507_p5, %p501_p12 }
  0x2c   : > { %511 = shalt.err (!%p508_p7)
}
  0x2d   : > { %s615_s26 = smov 32   ;;  %s616_s27 = smov 2  }
  0x2e   : > { %434 = dma.hbm_to_vmem [thread:$0]  (!%p708_p13), %s704_s28, 256, %s712_s30, %s118_s4, %s615_s26, %s615_s26, %s616_s27  }
  0x2f   : > { %p405_p9 = scmp.ge.s32.totalorder %s612_s12, 1  ;;  %p157_p3 = scmp.lt.s32.totalorder %s612_s12, 3 }
  0x30   : > { %s402_s29 = sshll.u32 %s697_s23, 3  ;;  %s423_s6 = sshll.u32 %s612_s12, 7 }
  0x31   : > { %p745_p11 = pnand %p405_p9, %p157_p3  ;;  %s142_s7 = scalar_lea.vmem [#allocation5], %s402_s29 }
  0x32   : > { %s149_s8 = sshll.u32 %s142_s7, 4  ;;  %s753_s17 = scalar_lea.hbm %s892_s1, %s423_s6  ;;  %s755_s8 = int_to_ptr.vmem [resolvable:$true] %s149_s8 }
  0x33   : > { %s139_s28 = scalar_lea.sflag [#allocation6], %s697_s23  ;;  %s512_s30 = scalar_lea.hbm %s753_s17, 128 }
  0x34   : > { %p513_p12 = scmp.ne.s32.totalorder %s753_s17, %s512_s30  ;;  %s517_s24 = scalar_lea.hbm %s892_s1, 256 }
  0x35   : > { %p518_p0 = scmp.lt.u32.totalorder %s753_s17, %s892_s1  ;;  %p519_p2 = scmp.lt.u32.totalorder %s517_s24, %s512_s30 }
  0x36   : > { %p515_p8 = pnand %p513_p12, %p484_p1  ;;  %p521_p5 = scmp.lt.u32.totalorder %s512_s30, %s753_s17 }
  0x37   : > { %p520_p4 = por %p519_p2, %p518_p0 }
  0x38   : > { %p516_p10 = pneg %p515_p8 }
  0x39   : > { %p522_p7 = por %p521_p5, %p520_p4 }
  0x3b   : > { %p523_p9 = pnand %p522_p7, %p516_p10 }
  0x3d   : > { %526 = shalt.err (!%p523_p9)
}
  0x3e   : > { %s527_s27 = scalar_lea.vmem %s755_s8, 128  ;;  %s617_s29 = smov [#allocation5]  }
  0x3f   : > { %p528_p3 = scmp.ne.s32.totalorder %s755_s8, %s527_s27  ;;  %s532_s6 = sshll.u32 %s617_s29, 4  ;;  %s533_s6 = int_to_ptr.vmem [resolvable:$false] %s532_s6 }
  0x40   : > { %s534_s7 = scalar_lea.vmem %s533_s6, 256  ;;  %p535_p6 = scmp.lt.s32.totalorder %s755_s8, %s533_s6 }
  0x41   : > { %p530_p12 = pnand %p528_p3, %p484_p1  ;;  %p536_p0 = scmp.lt.s32.totalorder %s534_s7, %s527_s27 }
  0x43   : > { %p531_p8 = pneg %p530_p12  ;;  %p537_p2 = por %p536_p0, %p535_p6 }
  0x45   : > { %p538_p4 = pnand %p537_p2, %p531_p8 }
  0x47   : > { %541 = shalt.err (!%p538_p4)
}
  0x48   : > { %s618_s14 = smov 16   ;;  %s619_s16 = smov 1  }
  0x49   : > { %437 = dma.hbm_to_vmem [thread:$0]  (!%p708_p13), %s753_s17, 128, %s755_s8, %s139_s28, %s618_s14, %s618_s14, %s619_s16  }
  0x4a   : > { %161 = sbr.rel (%p745_p11) target bundleno = 118 (0x76), region = 28  ;;  %s786_s30 = sand.u32 (!%p745_p11), 1, %s604_s10  }
  0x4b   : > { %s406_s4 = sshll.u32 (!%p745_p11), %s786_s30, 4  ;;  %s164_s19 = scalar_lea.sflag (!%p745_p11), [#allocation3], %s786_s30 }
  0x4c   : > { %s790_s24 = scalar_lea.vmem (!%p745_p11), [#allocation2], %s406_s4  ;;  %p902_p6 = scmp.ne.s32.totalorder (!%p745_p11), %s897_s20, 0 }
  0x51   : > { %587 = dma.done.wait (%p902_p6), %s164_s19, 256  }
  0x52   : > { %589 = vsyncadd (%p902_p6), %s164_s19, 4294967040  ;;  %s407_s23 = sshll.u32 %s786_s30, 3  ;;  %s173_s3 = scalar_lea.sflag [#allocation6], %s786_s30 }
  0x53   : > { %s798_s5 = scalar_lea.vmem [#allocation5], %s407_s23 }
  0x54   : > { %591 = dma.done.wait (%p902_p6), %s173_s3, 128  }
  0x55   : > { %593 = vsyncadd (%p902_p6), %s173_s3, 4294967168  ;;  %vm277_vm0 = vcmask 254976   ;;  %s804_s8 = scalar_lea.vmem [#allocation7], %s406_s4  ;;  %s424_s28 = sshll.u32 %s659_s13, 8  ;;  %v205_v0 = vld [vmem:[%s790_s24] sm:$0x3] }
  0x56   : > { %s300_s17 = sshll.u32 %s804_s8, 4  ;;  %v409_v1 = vld [vmem:[%s798_s5] ss:$0 sm:$0xff]  ;;  %v206_v2 = vld [vmem:[%s790_s24 + $0x2] sm:$0x3]  ;;  %s839_s26 = scalar_lea.hbm %s893_s2, %s424_s28  ;;  %s829_s17 = int_to_ptr.vmem [resolvable:$true] %s300_s17 }
  0x57   : > { %v269_v3 = vadd.f32 %v409_v1, %v205_v0  ;;  %v410_v4 = vld [vmem:[%s798_s5 + $0x1] ss:$0 sm:$0xff]  ;;  %v207_v5 = vld [vmem:[%s790_s24 + $0x4] sm:$0x3]  ;;  %v411_v6 = vld [vmem:[%s798_s5 + $0x2] ss:$0 sm:$0xff] }
  0x58   : > { %v270_v7 = vadd.f32 %v410_v4, %v206_v2  ;;  %v271_v8 = vadd.f32 %v411_v6, %v207_v5  ;;  %v208_v9 = vld [vmem:[%s790_s24 + $0x6] sm:$0x3]  ;;  %v412_v10 = vld [vmem:[%s798_s5 + $0x3] ss:$0 sm:$0xff]  ;;  %v209_v11 = vld [vmem:[%s790_s24 + $0x8] sm:$0x3] }
  0x59   : > { %278 = vst.msk [vmem:[%s804_s8] sm:$0x3] %vm277_vm0, %v269_v3  ;;  %v272_v12 = vadd.f32 %v412_v10, %v208_v9  ;;  %v413_v13 = vld [vmem:[%s798_s5 + $0x4] ss:$0 sm:$0xff]  ;;  %v210_v14 = vld [vmem:[%s790_s24 + $0xa] sm:$0x3] }
  0x5a   : > { %v414_v15 = vld [vmem:[%s798_s5 + $0x5] ss:$0 sm:$0xff]  ;;  %279 = vst.msk [vmem:[%s804_s8 + $0x2] sm:$0x3] %vm277_vm0, %v270_v7  ;;  %280 = vst.msk [vmem:[%s804_s8 + $0x4] sm:$0x3] %vm277_vm0, %v271_v8  ;;  %v273_v16 = vadd.f32 %v413_v13, %v209_v11 }
  0x5b   : > { %v274_v17 = vadd.f32 %v414_v15, %v210_v14  ;;  %v211_v18 = vld [vmem:[%s790_s24 + $0xc] sm:$0x3]  ;;  %v415_v19 = vld [vmem:[%s798_s5 + $0x6] ss:$0 sm:$0xff]  ;;  %v212_v20 = vld [vmem:[%s790_s24 + $0xe] sm:$0x3] }
  0x5c   : > { %281 = vst.msk [vmem:[%s804_s8 + $0x6] sm:$0x3] %vm277_vm0, %v272_v12  ;;  %v275_v21 = vadd.f32 %v415_v19, %v211_v18  ;;  %v416_v22 = vld [vmem:[%s798_s5 + $0x7] ss:$0 sm:$0xff]  ;;  %282 = vst.msk [vmem:[%s804_s8 + $0x8] sm:$0x3] %vm277_vm0, %v273_v16 }
  0x5d   : > { %283 = vst.msk [vmem:[%s804_s8 + $0xa] sm:$0x3] %vm277_vm0, %v274_v17  ;;  %v276_v23 = vadd.f32 %v416_v22, %v212_v20  ;;  %s287_s27 = scalar_lea.sflag [#allocation4], %s786_s30  ;;  %s542_s29 = scalar_lea.vmem %s829_s17, 256 }
  0x5e   : > { %284 = vst.msk [vmem:[%s804_s8 + $0xc] sm:$0x3] %vm277_vm0, %v275_v21  ;;  %p543_p13 = scmp.ne.s32.totalorder %s829_s17, %s542_s29  ;;  %p903_p1 = scmp.ne.s32.totalorder %s898_s21, 0 }
  0x5f   : > { %285 = vst.msk [vmem:[%s804_s8 + $0xe] sm:$0x3] %vm277_vm0, %v276_v23  ;;  %s620_s13 = smov [#allocation7]  }
  0x60   : > { %p544_p11 = pnand %p543_p13, %p903_p1  ;;  %s546_s6 = sshll.u32 %s620_s13, 4  ;;  %s547_s6 = int_to_ptr.vmem [resolvable:$false] %s546_s6 }
  0x61   : > { %s548_s7 = scalar_lea.vmem %s547_s6, 512  ;;  %p549_p5 = scmp.lt.s32.totalorder %s829_s17, %s547_s6 }
  0x62   : > { %p545_p10 = pneg %p544_p11  ;;  %p550_p7 = scmp.lt.s32.totalorder %s548_s7, %s542_s29 }
  0x64   : > { %p551_p9 = por %p550_p7, %p549_p5 }
  0x66   : > { %p552_p3 = pnand %p551_p9, %p545_p10 }
  0x68   : > { %555 = shalt.err (!%p552_p3)
}
  0x69   : > { %s556_s14 = scalar_lea.hbm %s839_s26, 256  ;;  %s560_s19 = scalar_lea.hbm %s893_s2, 512 }
  0x6a   : > { %p557_p12 = scmp.ne.s32.totalorder %s839_s26, %s556_s14  ;;  %p561_p2 = scmp.lt.u32.totalorder %s839_s26, %s893_s2 }
  0x6b   : > { %p562_p4 = scmp.lt.u32.totalorder %s560_s19, %s556_s14  ;;  %p564_p13 = scmp.lt.u32.totalorder %s556_s14, %s839_s26 }
  0x6c   : > { %p558_p8 = pnand %p557_p12, %p903_p1 }
  0x6d   : > { %p563_p6 = por %p562_p4, %p561_p2 }
  0x6e   : > { %p559_p0 = pneg %p558_p8 }
  0x6f   : > { %p565_p11 = por %p564_p13, %p563_p6 }
  0x71   : > { %p566_p10 = pnand %p565_p11, %p559_p0 }
  0x73   : > { %569 = shalt.err (!%p566_p10)
}
  0x74   : > { %s621_s3 = smov 32   ;;  %s622_s5 = smov 2  }
  0x75   : > { %429 = dma.vmem_to_hbm [thread:$0]  (%p903_p1), %s829_s17, 256, %s839_s26, %s287_s27, %s621_s3, %s621_s3, %s622_s5  }
  0x76 PF: > { %s315_s8 = sand.u32 1, %s600_s9   ;;  %p904_p5 = scmp.ne.s32.totalorder %s899_s22, 0 }
  0x77   : > { %p905_p7 = scmp.ge.s32.totalorder %s612_s12, 2  ;;  %s316_s28 = scalar_lea.sflag [#allocation4], %s315_s8 }
  0x79   : > { %p439_p9 = pnand %p905_p7, %p904_p5 }
  0x7b   : > { %595 = dma.done.wait (!%p439_p9), %s316_s28, 256  }
  0x7c   : > { %597 = vsyncadd (!%p439_p9), %s316_s28, 4294967040  ;;  %p18_p3 = scmp.ge.s32.totalorder %s663_s15, 4   ;;  %s906_s9 = smov %s604_s10 }
  0x7d   : > { %s907_s10 = smov %s608_s11  ;;  %s908_s11 = smov %s675_s18 }
  0x7e   : > { %s909_s12 = smov %s663_s15  ;;  %20 = sbr.rel (!%p18_p3) target bundleno = 7 (0x7), region = 86 }
  0x85   :  { %321 = vsyncpa [#allocation3], 1 }
  0x86   :  { %323 = vsyncpa [#allocation3 + $0x1], 1 }
  0x87   :  { %324 = vsyncpa [#allocation6], 1 }
  0x88   :  { %326 = vsyncpa [#allocation6 + $0x1], 1 }
  0x89   :  { %327 = vsyncpa [#allocation4], 1 }
  0x8a   :  { %329 = vsyncpa [#allocation4 + $0x1], 1 }

</bundles_post_ra>
